<compile_context>
chip_gen: v7x
topology: tpu7x:2x2x1
jax: 0.10.0
libtpu: 0.0.40
codegen_flags: <defaults>
</compile_context>

<pallas_src>
import jax
import jax.numpy as jnp
from jax import lax
from jax.experimental import pallas as pl
from jax.experimental.pallas import tpu as pltpu


def _nsp_head_kernel(x_ref, w_ref, b_ref, o_ref):
    # x_ref: [TB, H], w_ref: [2, H] (lane-dense along H), b_ref: [1, 2] f32,
    # o_ref: [TB, 2]
    x = x_ref[...]
    w = w_ref[...]
    # (TB, H) x (2, H) contracting the hidden axis of both -> (TB, 2) on the MXU.
    acc = lax.dot_general(
        x,
        w,
        dimension_numbers=(((1,), (1,)), ((), ())),
        preferred_element_type=jnp.float32,
    )
    o_ref[...] = (acc + b_ref[...]).astype(o_ref.dtype)


def _padded_vmem_bytes(rows, cols, dtype):
    """Bytes of a 2-D VMEM tile after (8, 128) tiling/padding."""
    rp = -(-rows // 8) * 8
    cp = -(-cols // 128) * 128
    return rp * cp * jnp.dtype(dtype).itemsize


def bert_only_nsp_head(pooled_output, weight, bias, *, block_b=512):
    """pooled_output: [B, H]; weight: [2, H] (PyTorch [out, in]); bias: [2]."""
    B, H = pooled_output.shape
    out_dim, H_w = weight.shape
    assert H_w == H and out_dim == 2 and bias.shape == (2,)

    # Batch tile: ~512 rows (multiple of 8 for f32 sublanes). If the whole
    # batch is smaller, the block covers the full batch extent, which also
    # satisfies the TPU tiling rule (block dim == array dim).
    if B <= block_b:
        tb = B
    else:
        tb = block_b
    grid_b = pl.cdiv(B, tb)

    bias_f32 = bias.astype(jnp.float32).reshape(1, 2)

    x_elt = jnp.dtype(pooled_output.dtype).itemsize
    w_elt = jnp.dtype(weight.dtype).itemsize
    o_elt = x_elt  # output dtype == input dtype

    # Scoped-VMEM budget: double-buffered x and out tiles + resident weight/bias
    # (conservatively doubled) + headroom. Stays well under 32 MiB scoped / 64 MiB
    # physical on v7x for BERT-scale hidden sizes.
    vmem_bytes = (
        2 * _padded_vmem_bytes(tb, H, pooled_output.dtype)
        + 2 * _padded_vmem_bytes(tb, 2, pooled_output.dtype)
        + 2 * _padded_vmem_bytes(2, H, weight.dtype)
        + 2 * _padded_vmem_bytes(1, 2, jnp.float32)
        + (1 << 20)
    )
    vmem_limit = int(min(max(vmem_bytes, 4 << 20), 64 << 20))

    cost = pl.CostEstimate(
        flops=4 * B * H,  # 2 * B * H * 2
        transcendentals=0,
        bytes_accessed=B * H * x_elt + 2 * H * w_elt + B * 2 * o_elt + 2 * 4,
    )

    return pl.pallas_call(
        _nsp_head_kernel,
        out_shape=jax.ShapeDtypeStruct((B, 2), pooled_output.dtype),
        grid=(grid_b,),
        in_specs=[
            pl.BlockSpec((tb, H), lambda i: (i, 0)),   # stream x over batch tiles
            pl.BlockSpec((2, H), lambda i: (0, 0)),    # weight resident in VMEM
            pl.BlockSpec((1, 2), lambda i: (0, 0)),    # f32 bias resident in VMEM
        ],
        out_specs=pl.BlockSpec((tb, 2), lambda i: (i, 0)),
        compiler_params=pltpu.CompilerParams(
            dimension_semantics=("parallel",),
            vmem_limit_bytes=vmem_limit,
        ),
        cost_estimate=cost,
    )(pooled_output, weight, bias_f32)


if __name__ == "__main__":
    batch = 2
    hidden = 32

    key = jax.random.PRNGKey(0)
    k_x, k_w, k_b = jax.random.split(key, 3)

    pooled_output = jax.random.normal(k_x, (batch, hidden), dtype=jnp.float32)
    # "Linear(hidden_size, 2)" parameters in PyTorch layout [out, in].
    weight = jax.random.normal(k_w, (2, hidden), dtype=jnp.float32) * 0.02
    bias = jax.random.normal(k_b, (2,), dtype=jnp.float32) * 0.02

    out = bert_only_nsp_head(pooled_output, weight, bias)
    out = jax.block_until_ready(out)

    # Sanity check against plain-JAX reference (x @ W.T + b).
    ref = pooled_output @ weight.T + bias
    assert out.shape == (batch, 2)
    assert jnp.allclose(out, ref, atol=1e-5, rtol=1e-5)

    # Also exercise the batch-tiled path (multiple grid steps, ragged last tile).
    big_b = 1030
    xb = jax.random.normal(jax.random.PRNGKey(1), (big_b, hidden), dtype=jnp.float32)
    out_b = jax.block_until_ready(bert_only_nsp_head(xb, weight, bias))
    ref_b = xb @ weight.T + bias
    assert out_b.shape == (big_b, 2)
    assert jnp.allclose(out_b, ref_b, atol=1e-5, rtol=1e-5)

    print("KERNEL_OK")
</pallas_src>

<mosaic_0001>
module attributes {stable_mosaic.version = 11 : i64} {
  func.func @_nsp_head_kernel(%arg0: i32, %arg1: memref<2x32xf32, #tpu.memory_space<vmem>>, %arg2: memref<2x32xf32, #tpu.memory_space<vmem>>, %arg3: memref<1x2xf32, #tpu.memory_space<vmem>>, %arg4: memref<2x2xf32, #tpu.memory_space<vmem>>) attributes {dimension_semantics = [#tpu.dimension_semantics<parallel>], iteration_bounds = array<i64: 1>, scalar_prefetch = 0 : i64, scratch_operands = 0 : i64, tpu.core_type = #tpu.core_type<tc>, window_params = [{transform_indices = @transform_0, window_bounds = array<i64: 2, 32>}, {pipeline_mode = #tpu.pipeline_mode<synchronous>, transform_indices = @transform_1, window_bounds = array<i64: 2, 32>}, {pipeline_mode = #tpu.pipeline_mode<synchronous>, transform_indices = @transform_2, window_bounds = array<i64: 1, 2>}, {transform_indices = @transform_3, window_bounds = array<i64: 2, 2>}]} {
    %c0 = arith.constant 0 : index
    %c0_0 = arith.constant 0 : index
    %0 = vector.load %arg1[%c0, %c0_0] : memref<2x32xf32, #tpu.memory_space<vmem>>, vector<2x32xf32>
    %c0_1 = arith.constant 0 : index
    %c0_2 = arith.constant 0 : index
    %1 = vector.load %arg2[%c0_1, %c0_2] : memref<2x32xf32, #tpu.memory_space<vmem>>, vector<2x32xf32>
    %cst = arith.constant dense<0.000000e+00> : vector<2x2xf32>
    %2 = tpu.matmul %0, %1, %cst {dimension_numbers = #tpu.dot_dimension_numbers<[1], [1], [0], [0], [0, 0, 1, 0], [], []>} : vector<2x32xf32>, vector<2x32xf32>, vector<2x2xf32> -> vector<2x2xf32>
    %c0_3 = arith.constant 0 : index
    %c0_4 = arith.constant 0 : index
    %3 = vector.load %arg3[%c0_3, %c0_4] : memref<1x2xf32, #tpu.memory_space<vmem>>, vector<1x2xf32>
    %4 = vector.broadcast %3 : vector<1x2xf32> to vector<2x2xf32>
    %5 = arith.addf %2, %4 : vector<2x2xf32>
    %c0_5 = arith.constant 0 : index
    %c0_6 = arith.constant 0 : index
    %6 = vector.load %arg4[%c0_5, %c0_6] : memref<2x2xf32, #tpu.memory_space<vmem>>, vector<2x2xf32>
    tpu.vector_store %arg4[%c0_5, %c0_6], %5 {strides = array<i32>} : memref<2x2xf32, #tpu.memory_space<vmem>>, vector<2x2xf32>,
    return
  }
  func.func @transform_0(%arg0: i32) -> (i32, i32) {
    %c0_i32 = arith.constant 0 : i32
    %c0_i32_0 = arith.constant 0 : i32
    return %arg0, %c0_i32 : i32, i32
  }
  func.func @transform_1(%arg0: i32) -> (i32, i32) {
    %c0_i32 = arith.constant 0 : i32
    %c0_i32_0 = arith.constant 0 : i32
    %c0_i32_1 = arith.constant 0 : i32
    return %c0_i32, %c0_i32_0 : i32, i32
  }
  func.func @transform_2(%arg0: i32) -> (i32, i32) {
    %c0_i32 = arith.constant 0 : i32
    %c0_i32_0 = arith.constant 0 : i32
    %c0_i32_1 = arith.constant 0 : i32
    return %c0_i32, %c0_i32_0 : i32, i32
  }
  func.func @transform_3(%arg0: i32) -> (i32, i32) {
    %c0_i32 = arith.constant 0 : i32
    %c0_i32_0 = arith.constant 0 : i32
    return %arg0, %c0_i32 : i32, i32
  }
}

</mosaic_0001>

<bundles_post_ra>
// kernel: tpu_custom_call.1
= control target key start
LH: loop header
LB: loop body
LE: loop exit
PB: predicated region body
PF: predicated region fallthrough
CT: control target
= control target key end

     0   :  { %8 = vsyncpa [#allocation3], 0  ;;  %s246_s0 = inlined_call_operand.hbm [shape: f32[2,32], index: 0, kind: input, shape index: {}]   ;;  %s247_s1 = inlined_call_operand.vmem [shape: f32[2,32], index: 1, kind: input, shape index: {}]   ;;  %s248_s2 = inlined_call_operand.vmem [shape: f32[1,2], index: 2, kind: input, shape index: {}]   ;;  %s249_s3 = inlined_call_operand.hbm [shape: f32[2,2], index: 3, kind: output, shape index: {}]  }
   0x1   :  { %9 = vsyncpa [#allocation4], 0  ;;  %s192_s12 = smov [#allocation2]   ;;  %s144_s16 = scalar_lea.hbm %s246_s0, 32 }
   0x2   :  { %s16_s13 = sshll.u32 %s192_s12, 4  ;;  %p145_p0 = scmp.ne.s32.totalorder %s246_s0, %s144_s16  ;;  %s17_s13 = int_to_ptr.vmem [resolvable:$true] %s16_s13 }
   0x3   :  { %p148_p1 = scmp.lt.u32.totalorder %s144_s16, %s246_s0 }
   0x5   :  { %p150_p2 = pnand %p148_p1, %p145_p0 }
   0x7   :  { %153 = shalt.err (!%p150_p2)
}
   0x8   :  { %s154_s21 = scalar_lea.vmem %s17_s13, 32  ;;  %p159_p4 = scmp.lt.s32.totalorder %s17_s13, %s17_s13 }
   0x9   :  { %p155_p3 = scmp.ne.s32.totalorder %s17_s13, %s154_s21  ;;  %p160_p5 = scmp.lt.s32.totalorder %s154_s21, %s154_s21 }
   0xb   :  { %p161_p6 = por %p160_p5, %p159_p4 }
   0xd   :  { %p162_p7 = pnand %p161_p6, %p155_p3 }
   0xf   :  { %165 = shalt.err (!%p162_p7)
}
  0x10   :  { %19 = dma.hbm_to_vmem [thread:$0]  %s246_s0, 32, %s17_s13, [#allocation3]  }
  0x11   :  { %188 = dma.done.wait [#allocation3], 32  }
  0x12   :  { %189 = vsyncadd [#allocation3], 4294967264  ;;  %v193_v0 = vmov 0.0   ;;  %vm194_vm0 = vmmov 0   ;;  %vm36_vm1 = vcmask 261120   ;;  %s195_s28 = smov [#allocation5]  }
  0x13   :  { %135 = vmatprep.subr.mxu0 %v193_v0  ;;  %137 = vmatprep.mubr.msk.f32.mxu0 %vm194_vm0, %v193_v0  ;;  %v28_v1 = vld [vmem:[%s247_s1] sm:$0x3]  ;;  %s121_s0 = sshll.u32 %s195_s28, 4  ;;  %vm113_vm2 = vcmask 9216   ;;  %s122_s0 = int_to_ptr.vmem [resolvable:$true] %s121_s0 }
  0x14   :  { %136 = vmatpush3.xpose.msk.msra.mxu0 %vm36_vm1, %v28_v1  ;;  %v27_v2 = vld [vmem:[#allocation2] sm:$0x3]  ;;  %s166_s29 = scalar_lea.vmem %s122_s0, 32  ;;  %p171_p9 = scmp.lt.s32.totalorder %s122_s0, %s122_s0 }
  0x15   :  { %v130_v3 = vld [vmem:[%s248_s2] ss:$0 sm:$0xff]  ;;  %p167_p8 = scmp.ne.s32.totalorder %s122_s0, %s166_s29  ;;  %p172_p10 = scmp.lt.s32.totalorder %s166_s29, %s166_s29 }
  0x17   :  { %138 = vmatmul.mubr.msk.f32.vlgmr.msra.gmra.mrb[0].mxu0 %vm36_vm1, %v27_v2  ;;  %p173_p11 = por %p172_p10, %p171_p9 }
  0x19   :  { %p174_p12 = pnand %p173_p11, %p167_p8 }
  0xea   :  { %v109_v4 = vpop.f32.mrb[0].mxu0 }
  0xeb   :  { %v110_v5 = vadd.f32 %v130_v3, %v109_v4  ;;  %v139_v6 = vpop.f32.mrb[1].mxu0 }
  0xed   :  { %114 = vst.msk [vmem:[#allocation5] sm:$0x3] %vm113_vm2, %v110_v5 }
  0xee   :  { %177 = shalt.err (!%p174_p12)
}
  0xef   :  { %s178_s4 = scalar_lea.hbm %s249_s3, 32 }
  0xf0   :  { %p179_p13 = scmp.ne.s32.totalorder %s249_s3, %s178_s4  ;;  %p182_p0 = scmp.lt.u32.totalorder %s178_s4, %s249_s3 }
  0xf2   :  { %p184_p1 = pnand %p182_p0, %p179_p13 }
  0xf4   :  { %187 = shalt.err (!%p184_p1)
}
  0xf5   :  { %124 = dma.vmem_to_hbm [thread:$0]  %s122_s0, 32, %s249_s3, [#allocation4]  }
  0xf6   :  { %190 = dma.done.wait [#allocation4], 32  }
  0xf7   :  { %191 = vsyncadd [#allocation4], 4294967264 }
  0xf8   :  { %128 = vsyncpa [#allocation3], 1 }
  0xf9   :  { %129 = vsyncpa [#allocation4], 1 }

</bundles_post_ra>
